<compile_context>
chip_gen: v7x
topology: tpu7x:2x2x1
jax: 0.10.0
libtpu: 0.0.40
codegen_flags: <defaults>
</compile_context>

<pallas_src>
import functools

import jax
import jax.numpy as jnp
from jax.experimental import pallas as pl
from jax.experimental.pallas import tpu as pltpu


def _round_up(x, m):
    return (x + m - 1) // m * m


def _two_layer_kernel(x_ref, w1_ref, b1_ref, w2_ref, b2_ref, o_ref):
    # hidden = relu(x @ W1^T + b1): bf16 operands on the MXU, f32 accumulation.
    h = jnp.dot(x_ref[...], w1_ref[...], preferred_element_type=jnp.float32)
    h = jnp.maximum(h + b1_ref[...], 0.0)            # bias + ReLU in f32
    # dropout: identity in eval mode
    # y = hidden @ W2^T + b2 ; re-cast hidden to bf16 only for the MXU.
    y = jnp.dot(h.astype(w2_ref.dtype), w2_ref[...],
                preferred_element_type=jnp.float32)
    o_ref[...] = (y + b2_ref[...]).astype(o_ref.dtype)


def prepare_params(w1, b1, w2, b2, compute_dtype=jnp.bfloat16):
    """One-time parameter preprocessing (hoisted out of the hot path).

    w1: (H, D_in), b1: (H,), w2: (D_out, H), b2: (D_out,)  -- PyTorch layout.
    Returns (params dict with pre-transposed / lane-padded weights, D_out).
    """
    H, D_in = w1.shape
    D_out = w2.shape[0]
    d_out_pad = _round_up(D_out, 128)                       # lane-dense output

    w1_t = jnp.asarray(w1).T.astype(compute_dtype)          # (D_in, H)
    w2_t = jnp.asarray(w2).T.astype(compute_dtype)          # (H, D_out)
    w2_t = jnp.pad(w2_t, ((0, 0), (0, d_out_pad - D_out)))  # (H, D_out_pad)
    b1_r = jnp.asarray(b1).reshape(1, H).astype(jnp.float32)
    b2_r = jnp.pad(jnp.asarray(b2).reshape(1, D_out).astype(jnp.float32),
                   ((0, 0), (0, d_out_pad - D_out)))        # (1, D_out_pad)
    return {"w1_t": w1_t, "b1": b1_r, "w2_t": w2_t, "b2": b2_r}, D_out


@functools.partial(jax.jit, static_argnames=("d_out", "block_m"))
def two_layer_net(x, params, *, d_out, block_m=None):
    """Fused forward pass: relu(x @ W1^T + b1) @ W2^T + b2 (eval-mode dropout)."""
    N, D_in = x.shape
    w1_t, b1_r = params["w1_t"], params["b1"]
    w2_t, b2_r = params["w2_t"], params["b2"]
    H = w1_t.shape[1]
    d_out_pad = w2_t.shape[1]
    cdt = w1_t.dtype

    # Batch tile: multiple of 8 sublanes, capped so tiles stay well inside the
    # v7x scoped-VMEM budget even for large N.
    if block_m is None:
        block_m = min(512, _round_up(N, 8))
    tm = int(block_m)
    n_pad = _round_up(max(N, tm), tm)

    x_p = x.astype(cdt)
    if n_pad != N:
        x_p = jnp.pad(x_p, ((0, n_pad - N), (0, 0)))

    grid = (n_pad // tm,)

    # VMEM budget: double-buffered x/out tiles + resident weights/biases +
    # intermediates, with 2x headroom; clamped to a range safe on v7x (64 MiB
    # physical / 32 MiB default scoped).
    itemsize = jnp.dtype(cdt).itemsize
    budget = (2 * (2 * tm * D_in * itemsize)             # x tiles (dbl-buffered)
              + 2 * (2 * tm * d_out_pad * 4)             # out tiles
              + (D_in * H + H * d_out_pad) * itemsize    # resident weights
              + (H + d_out_pad) * 4                      # biases
              + tm * (H + d_out_pad) * 4)                # f32 intermediates
    vmem_limit = int(min(max(2 * budget + (4 << 20), 8 << 20), 32 << 20))

    flops = 2 * n_pad * (D_in * H + H * d_out_pad)
    bytes_accessed = (n_pad * D_in * itemsize
                      + (D_in * H + H * d_out_pad) * itemsize
                      + (H + d_out_pad) * 4
                      + n_pad * d_out_pad * 4)

    out = pl.pallas_call(
        _two_layer_kernel,
        out_shape=jax.ShapeDtypeStruct((n_pad, d_out_pad), jnp.float32),
        grid_spec=pltpu.PrefetchScalarGridSpec(
            num_scalar_prefetch=0,
            grid=grid,
            in_specs=[
                pl.BlockSpec((tm, D_in), lambda i: (i, 0)),        # x tile
                pl.BlockSpec((D_in, H), lambda i: (0, 0)),         # W1 (resident)
                pl.BlockSpec((1, H), lambda i: (0, 0)),            # b1
                pl.BlockSpec((H, d_out_pad), lambda i: (0, 0)),    # W2 (resident)
                pl.BlockSpec((1, d_out_pad), lambda i: (0, 0)),    # b2
            ],
            out_specs=pl.BlockSpec((tm, d_out_pad), lambda i: (i, 0)),
        ),
        compiler_params=pltpu.CompilerParams(
            dimension_semantics=("parallel",),
            vmem_limit_bytes=vmem_limit),
        cost_estimate=pl.CostEstimate(flops=flops, transcendentals=0,
                                      bytes_accessed=bytes_accessed),
    )(x_p, w1_t, b1_r, w2_t, b2_r)

    # Strip batch padding and the lane padding of the output.
    return out[:N, :d_out]


def _torch_like_linear_init(key, out_features, in_features):
    """Deterministic init mimicking torch.nn.Linear defaults:
    U(-1/sqrt(in), 1/sqrt(in)) for both weight and bias."""
    bound = 1.0 / jnp.sqrt(jnp.float32(in_features))
    kw, kb = jax.random.split(key)
    w = jax.random.uniform(kw, (out_features, in_features),
                           minval=-bound, maxval=bound, dtype=jnp.float32)
    b = jax.random.uniform(kb, (out_features,),
                           minval=-bound, maxval=bound, dtype=jnp.float32)
    return w, b


if __name__ == "__main__":
    # Small shapes consistent with the MLP: batch=16, D_in=32, H=32, D_out=8.
    N, D_in, H, D_out = 16, 32, 32, 8

    key = jax.random.PRNGKey(0)
    kx, k1, k2 = jax.random.split(key, 3)

    x = jax.random.normal(kx, (N, D_in), dtype=jnp.float32)
    w1, b1 = _torch_like_linear_init(k1, H, D_in)
    w2, b2 = _torch_like_linear_init(k2, D_out, H)

    params, d_out = prepare_params(w1, b1, w2, b2)

    # block_m=8 forces a >1 grid so the tiled / pipelined path is exercised.
    y = two_layer_net(x, params, d_out=d_out, block_m=8)
    jax.block_until_ready(y)
    assert y.shape == (N, D_out)

    # Reference along the same bf16-matmul / f32-accumulate path.
    xb = x.astype(jnp.bfloat16)
    w1b = w1.astype(jnp.bfloat16)
    w2b = w2.astype(jnp.bfloat16)
    h_ref = jnp.maximum(
        jnp.dot(xb, w1b.T, preferred_element_type=jnp.float32) + b1, 0.0)
    y_ref = jnp.dot(h_ref.astype(jnp.bfloat16), w2b.T,
                    preferred_element_type=jnp.float32) + b2
    assert jnp.allclose(y, y_ref, atol=1e-3, rtol=1e-3), \
        float(jnp.max(jnp.abs(y - y_ref)))

    # Loose check against the pure-f32 reference (only bf16 MXU rounding).
    h32 = jnp.maximum(x @ w1.T + b1, 0.0)
    y32 = h32 @ w2.T + b2
    assert jnp.allclose(y, y32, atol=5e-2, rtol=5e-2), \
        float(jnp.max(jnp.abs(y - y32)))

    print("KERNEL_OK")
</pallas_src>

<mosaic_0001>
module attributes {stable_mosaic.version = 11 : i64} {
  func.func @_two_layer_kernel(%arg0: i32, %arg1: memref<8x32xbf16, #tpu.memory_space<vmem>>, %arg2: memref<32x32xbf16, #tpu.memory_space<vmem>>, %arg3: memref<1x32xf32, #tpu.memory_space<vmem>>, %arg4: memref<32x128xbf16, #tpu.memory_space<vmem>>, %arg5: memref<1x128xf32, #tpu.memory_space<vmem>>, %arg6: memref<8x128xf32, #tpu.memory_space<vmem>>) attributes {dimension_semantics = [#tpu.dimension_semantics<parallel>], iteration_bounds = array<i64: 2>, scalar_prefetch = 0 : i64, scratch_operands = 0 : i64, tpu.core_type = #tpu.core_type<tc>, window_params = [{transform_indices = @transform_0, window_bounds = array<i64: 8, 32>}, {pipeline_mode = #tpu.pipeline_mode<synchronous>, transform_indices = @transform_1, window_bounds = array<i64: 32, 32>}, {pipeline_mode = #tpu.pipeline_mode<synchronous>, transform_indices = @transform_2, window_bounds = array<i64: 1, 32>}, {pipeline_mode = #tpu.pipeline_mode<synchronous>, transform_indices = @transform_3, window_bounds = array<i64: 32, 128>}, {pipeline_mode = #tpu.pipeline_mode<synchronous>, transform_indices = @transform_4, window_bounds = array<i64: 1, 128>}, {transform_indices = @transform_5, window_bounds = array<i64: 8, 128>}]} {
    %c0 = arith.constant 0 : index
    %c0_0 = arith.constant 0 : index
    %0 = vector.load %arg1[%c0, %c0_0] : memref<8x32xbf16, #tpu.memory_space<vmem>>, vector<8x32xbf16>
    %c0_1 = arith.constant 0 : index
    %c0_2 = arith.constant 0 : index
    %1 = vector.load %arg2[%c0_1, %c0_2] : memref<32x32xbf16, #tpu.memory_space<vmem>>, vector<32x32xbf16>
    %cst = arith.constant dense<0.000000e+00> : vector<8x32xf32>
    %2 = tpu.matmul %0, %1, %cst {dimension_numbers = #tpu.dot_dimension_numbers<[1], [0], [0], [1], [0, 0, 1, 1], [], []>} : vector<8x32xbf16>, vector<32x32xbf16>, vector<8x32xf32> -> vector<8x32xf32>
    %c0_3 = arith.constant 0 : index
    %c0_4 = arith.constant 0 : index
    %3 = vector.load %arg3[%c0_3, %c0_4] : memref<1x32xf32, #tpu.memory_space<vmem>>, vector<1x32xf32>
    %4 = vector.broadcast %3 : vector<1x32xf32> to vector<8x32xf32>
    %5 = arith.addf %2, %4 : vector<8x32xf32>
    %cst_5 = arith.constant 0.000000e+00 : f32
    %6 = vector.broadcast %cst_5 : f32 to vector<8x32xf32>
    %7 = arith.maximumf %5, %6 : vector<8x32xf32>
    %8 = arith.truncf %7 : vector<8x32xf32> to vector<8x32xbf16>
    %c0_6 = arith.constant 0 : index
    %c0_7 = arith.constant 0 : index
    %9 = vector.load %arg4[%c0_6, %c0_7] : memref<32x128xbf16, #tpu.memory_space<vmem>>, vector<32x128xbf16>
    %cst_8 = arith.constant dense<0.000000e+00> : vector<8x128xf32>
    %10 = tpu.matmul %8, %9, %cst_8 {dimension_numbers = #tpu.dot_dimension_numbers<[1], [0], [0], [1], [0, 0, 1, 1], [], []>} : vector<8x32xbf16>, vector<32x128xbf16>, vector<8x128xf32> -> vector<8x128xf32>
    %c0_9 = arith.constant 0 : index
    %c0_10 = arith.constant 0 : index
    %11 = vector.load %arg5[%c0_9, %c0_10] : memref<1x128xf32, #tpu.memory_space<vmem>>, vector<1x128xf32>
    %12 = vector.broadcast %11 : vector<1x128xf32> to vector<8x128xf32>
    %13 = arith.addf %10, %12 : vector<8x128xf32>
    %c0_11 = arith.constant 0 : index
    %c0_12 = arith.constant 0 : index
    %14 = vector.load %arg6[%c0_11, %c0_12] : memref<8x128xf32, #tpu.memory_space<vmem>>, vector<8x128xf32>
    tpu.vector_store %arg6[%c0_11, %c0_12], %13 {strides = array<i32>} : memref<8x128xf32, #tpu.memory_space<vmem>>, vector<8x128xf32>,
    return
  }
  func.func @transform_0(%arg0: i32) -> (i32, i32) {
    %c0_i32 = arith.constant 0 : i32
    %c0_i32_0 = arith.constant 0 : i32
    return %arg0, %c0_i32 : i32, i32
  }
  func.func @transform_1(%arg0: i32) -> (i32, i32) {
    %c0_i32 = arith.constant 0 : i32
    %c0_i32_0 = arith.constant 0 : i32
    %c0_i32_1 = arith.constant 0 : i32
    return %c0_i32, %c0_i32_0 : i32, i32
  }
  func.func @transform_2(%arg0: i32) -> (i32, i32) {
    %c0_i32 = arith.constant 0 : i32
    %c0_i32_0 = arith.constant 0 : i32
    %c0_i32_1 = arith.constant 0 : i32
    return %c0_i32, %c0_i32_0 : i32, i32
  }
  func.func @transform_3(%arg0: i32) -> (i32, i32) {
    %c0_i32 = arith.constant 0 : i32
    %c0_i32_0 = arith.constant 0 : i32
    %c0_i32_1 = arith.constant 0 : i32
    return %c0_i32, %c0_i32_0 : i32, i32
  }
  func.func @transform_4(%arg0: i32) -> (i32, i32) {
    %c0_i32 = arith.constant 0 : i32
    %c0_i32_0 = arith.constant 0 : i32
    %c0_i32_1 = arith.constant 0 : i32
    return %c0_i32, %c0_i32_0 : i32, i32
  }
  func.func @transform_5(%arg0: i32) -> (i32, i32) {
    %c0_i32 = arith.constant 0 : i32
    %c0_i32_0 = arith.constant 0 : i32
    return %arg0, %c0_i32 : i32, i32
  }
}

</mosaic_0001>

<bundles_post_ra>
// kernel: two_layer_net.1
= control target key start
LH: loop header
LB: loop body
LE: loop exit
PB: predicated region body
PF: predicated region fallthrough
CT: control target
= control target key end

     0   :  { %s504_s18 = smov 0   ;;  %s541_s0 = inlined_call_operand.vmem [shape: bf16[16,32], index: 0, kind: input, shape index: {}]   ;;  %s542_s1 = inlined_call_operand.vmem [shape: bf16[32,32], index: 1, kind: input, shape index: {}]   ;;  %s543_s2 = inlined_call_operand.vmem [shape: f32[1,32], index: 2, kind: input, shape index: {}]   ;;  %s544_s3 = inlined_call_operand.vmem [shape: bf16[32,128], index: 3, kind: input, shape index: {}]   ;;  %s545_s4 = inlined_call_operand.vmem [shape: f32[1,128], index: 4, kind: input, shape index: {}]   ;;  %s546_s5 = inlined_call_operand.vmem [shape: f32[16,128], index: 5, kind: output, shape index: {}]  }
   0x1 LB: > { %s411_s19 = sadd.s32 4294967295, %s470_s18   ;;  %p415_p0 = scmp.ge.s32.totalorder %s470_s18, 1  ;;  %s470_s18 = sphi %s504_s18, %s15_s18  }
   0x2   : > { %p186_p1 = scmp.lt.s32.totalorder %s470_s18, 3 }
   0x4   : > { %p187_p2 = pnand %p415_p0, %p186_p1 }
   0x5   : > { %v460_v0 = vld [vmem:[%s542_s1] sm:$0xff] (!%p187_p2)   ;;  %v472_v1 = vmov (!%p187_p2), 0.0   ;;  %v461_v2 = vld [vmem:[%s542_s1 + $0x8] sm:$0xff] (!%p187_p2)   ;;  %vm473_vm0 = vmmov (!%p187_p2), 0   ;;  %p212_p3 = scmp.lt.s32.totalorder (!%p187_p2), %s411_s19, 1  ;;  %vm245_vm1 = vcmask (!%p187_p2), 261120  }
   0x6   : > { %190 = sbr.rel (%p187_p2) target bundleno = 450 (0x1c2), region = 40  ;;  %434 = vmatprep.subr.bf16.mxu0 (!%p187_p2), %v472_v1  ;;  %442 = vmatprep.subr.bf16.mxu1 (!%p187_p2), %v472_v1  ;;  %v462_v4 = vld [vmem:[%s544_s3] sm:$0xff] (!%p187_p2)   ;;  %v463_v5 = vld [vmem:[%s544_s3 + $0x8] sm:$0xff] (!%p187_p2)  }
   0x7   : > { %435 = vmatpush3.bf16.msra.mxu0 (!%p187_p2), %v460_v0  ;;  %438 = vmatprep.mubr.msk.bf16.mxu0 (!%p187_p2), %vm473_vm0, %v472_v1  ;;  %v418_v6 = vld [vmem:[%s543_s2] ss:$0 sm:$0xff] (!%p187_p2) }
   0x8   : > { %436 = vmatprep.subr.bf16.mxu0 (!%p187_p2), %v472_v1  ;;  %446 = vmatprep.mubr.msk.bf16.mxu1 (!%p187_p2), %vm473_vm0, %v472_v1  ;;  %v422_v14 = vld [vmem:[%s545_s4] ss:$0 sm:$0xff] (!%p187_p2) }
   0x9   : > { %443 = vmatpush3.bf16.msra.mxu1 (!%p187_p2), %v462_v4 }
   0xa   : > { %444 = vmatprep.subr.bf16.mxu1 (!%p187_p2), %v472_v1 }
   0xb   : > { %437 = vmatpush3.bf16.msra.mxu0 (!%p187_p2), %v461_v2 }
   0xd   : > { %s548_s19 = smov (!%p212_p3, %s411_s19), 1  ;;  %445 = vmatpush3.bf16.msra.mxu1 %v463_v5 }
   0xe   : > { %s416_s24 = sshll.u32 %s548_s19, 2  ;;  %s417_s9 = sshll.u32 %s548_s19, 3 }
   0xf   : > { %s215_s27 = scalar_lea.vmem %s541_s0, %s416_s24  ;;  %s219_s14 = scalar_lea.vmem %s546_s5, %s417_s9 }
  0x10   : > { %v221_v3 = vld [vmem:[%s215_s27] sm:$0xf] }
  0x11   : > { %439 = vmatmul.mubr.msk.bf16.vlgmr.msra.gmra.mrb[0].mxu0 %vm245_vm1, %v221_v3 }
  0xe4   : > { %v283_v7 = vpop.f32.mrb[0].mxu0 }
  0xe5   : > { %v284_v8 = vadd.f32 %v418_v6, %v283_v7  ;;  %v440_v9 = vpop.f32.mrb[1].mxu0 }
  0xe6   : > { %v286_v10 = vpop.f32.mrb[2].mxu0 }
  0xe7   : > { %v289_v11 = vmax.f32 %v284_v8, 0.0  ;;  %v441_v12 = vpop.f32.mrb[3].mxu0 }
  0xe9   : > { %v290_v13 = vpack.c.bf16 %v289_v11, %v289_v11 }
  0xeb   : > { %447 = vmatmul.mubr.msk.bf16.vlgmr.msra.gmra.mrb[0].mxu1 %vm245_vm1, %v290_v13 }
 0x1be   : > { %v351_v15 = vpop.f32.mrb[0].mxu1 }
 0x1bf   : > { %v352_v16 = vadd.f32 %v422_v14, %v351_v15  ;;  %v448_v17 = vpop.f32.mrb[1].mxu1 }
 0x1c0   : > { %v354_v18 = vpop.f32.mrb[2].mxu1 }
 0x1c1   : > { %357 = vst [vmem:[%s219_s14] sm:$0xff] %v352_v16  ;;  %v449_v19 = vpop.f32.mrb[3].mxu1 }
 0x1c2 PF: > { %s15_s18 = sadd.s32 1, %s470_s18  }
 0x1c3   : > { %p12_p4 = scmp.ge.s32.totalorder %s15_s18, 4  }
 0x1c5   :  { %14 = sbr.rel (!%p12_p4) target bundleno = 1 (0x1), region = 70 }

</bundles_post_ra>
